<compile_context>
chip_gen: v5e
topology: v5e:2x2
jax: 0.10.0
libtpu: 0.0.40
codegen_flags: <defaults>
</compile_context>

<pallas_src>
import numpy as np
import jax
import jax.numpy as jnp
from jax.experimental import pallas as pl
from jax.experimental.pallas import tpu as pltpu


# ----------------------------------------------------------------------------
# Pallas kernel: B_BLK batch elements per grid step, everything lane-dense.
# ----------------------------------------------------------------------------
def attention_block_kernel(x_ref, g_ref, wth_ref, sel_ref, wphi_ref,
                           kg_ref, kp_ref, scal_ref, out_ref):
    f32 = jnp.float32
    b_blk = x_ref.shape[0]

    # packed per-channel scalars: col 0 = theta+phi bias, col 1 = psi weight,
    # col 2 = psi bias (replicated).
    b_tp = scal_ref[:, 0:1]                      # (Ci, 1)
    w_psi = scal_ref[:, 1:2]                     # (Ci, 1)
    b_psi = scal_ref[0:1, 2:3]                   # (1, 1)

    w_phi = wphi_ref[...]                        # (Ci, Cg)
    kg = kg_ref[...]                             # (Hg*Wg, H2*W2)
    kp = kp_ref[...]                             # (H2*W2, H*W)
    # hoist the small constant loads out of the batch loop
    sels = [sel_ref[t] for t in range(4)]        # each (H*W, H2*W2)
    wths = [wth_ref[t] for t in range(4)]        # each (Ci, Cin)

    for b in range(b_blk):                       # static unroll over batch block
        x_b = x_ref[b]                           # (Cin, H*W)   lane-dense
        g_b = g_ref[b]                           # (Cg, Hg*Wg)

        # theta_x = Conv2d(Cin -> Ci, k=2, s=2): per-tap selection matmul on the
        # flat spatial axis, then the (Ci, Cin) channel mix.
        x_t = jnp.dot(x_b, sels[0], preferred_element_type=f32)     # (Cin, H2*W2)
        theta = jnp.dot(wths[0], x_t, preferred_element_type=f32)   # (Ci, H2*W2)
        for t in range(1, 4):
            x_t = jnp.dot(x_b, sels[t], preferred_element_type=f32)
            theta = theta + jnp.dot(wths[t], x_t, preferred_element_type=f32)

        # phi_g = Conv2d(Cg -> Ci, k=1), then align_corners x2 bilinear upsample
        # (small dense operator: g lives at quarter resolution).
        phi = jnp.dot(w_phi, g_b, preferred_element_type=f32)       # (Ci, Hg*Wg)
        phi = jnp.dot(phi, kg, preferred_element_type=f32)          # (Ci, H2*W2)

        # add (conv biases fused) + ReLU
        act = jnp.maximum(theta + phi + b_tp, 0.0)                  # (Ci, H2*W2)

        # psi = sigmoid(Conv2d(Ci -> 1, k=1)): VPU weighted channel reduction
        logit = jnp.sum(act * w_psi, axis=0, keepdims=True) + b_psi  # (1, H2*W2)
        psi = jax.nn.sigmoid(logit)

        # align_corners x2 bilinear upsample of psi straight into the flat layout
        psi = jnp.dot(psi, kp, preferred_element_type=f32)          # (1, H*W)

        # gate x: broadcast over channels (sublanes), lane-dense store
        out_ref[b] = x_b * psi


# ----------------------------------------------------------------------------
# Glue: small precomputed operators, layout prep, pallas_call
# ----------------------------------------------------------------------------
def bilinear_up_matrix(s_in, s_out):
    """1-D bilinear interpolation matrix (s_out, s_in), align_corners=True."""
    U = np.zeros((s_out, s_in), dtype=np.float32)
    if s_in == 1:
        U[:, 0] = 1.0
        return U
    for i in range(s_out):
        src = i * (s_in - 1) / (s_out - 1)
        lo = int(np.floor(src))
        hi = min(lo + 1, s_in - 1)
        w = src - lo
        U[i, lo] += 1.0 - w
        U[i, hi] += w
    return U


def s2d_tap_selectors(H, W):
    """(4, H*W, H2*W2) 0/1 operators.  Right-multiplying a flat (C, H*W) image by
    tap t = kh*2+kw picks x[:, 2*i2+kh, 2*j2+kw] at flat position i2*W2+j2."""
    H2, W2 = H // 2, W // 2
    S = np.zeros((4, H * W, H2 * W2), dtype=np.float32)
    for kh in range(2):
        for kw in range(2):
            t = kh * 2 + kw
            for i2 in range(H2):
                for j2 in range(W2):
                    S[t, (2 * i2 + kh) * W + (2 * j2 + kw), i2 * W2 + j2] = 1.0
    return S


def _pick_batch_block(n, max_blk=8):
    """Largest batch block (<= max_blk) that still leaves >= 2 grid steps."""
    cands = [b for b in range(1, min(n, max_blk) + 1)
             if n % b == 0 and n // b >= 2]
    return max(cands) if cands else n


def attention_block_forward(x, g, params):
    """x: (N, Cin, H, W), g: (N, Cg, Hg, Wg)  -- NCHW, same as PyTorch."""
    N, Cin, H, W = x.shape
    _, Cg, Hg, Wg = g.shape
    H2, W2 = H // 2, W // 2
    assert 2 * Hg == H2 and 2 * Wg == W2, "shape contract of AttentionBlock"
    HW, H2W2, HgWg = H * W, H2 * W2, Hg * Wg

    f32 = jnp.float32
    x = x.astype(f32)
    g = g.astype(f32)
    w_theta = params["w_theta"].astype(f32)      # (Ci, Cin, 2, 2)
    b_theta = params["b_theta"].astype(f32)      # (Ci,)
    w_phi = params["w_phi"].astype(f32)          # (Ci, Cg, 1, 1)
    b_phi = params["b_phi"].astype(f32)          # (Ci,)
    w_psi = params["w_psi"].astype(f32)          # (1, Ci, 1, 1)
    b_psi = params["b_psi"].astype(f32)          # (1,)
    Ci = w_theta.shape[0]

    # Lane-dense views of x / g: metadata-only reshapes (trailing dims merge),
    # so x is read exactly once by the kernel and written exactly once.
    x_flat = x.reshape(N, Cin, HW)
    g_flat = g.reshape(N, Cg, HgWg)

    # 2x2/stride-2 conv weights, one (Ci, Cin) matrix per tap t = kh*2+kw.
    w_taps = jnp.transpose(w_theta, (2, 3, 0, 1)).reshape(4, Ci, Cin)
    sel = jnp.asarray(s2d_tap_selectors(H, W))                 # (4, HW, H2W2)

    # Separable align_corners 1-D operators folded into small flat-layout
    # (Kronecker) operators so the kernel never needs an (H, W) split/reshape.
    uh_g = bilinear_up_matrix(Hg, H2)      # (H2, Hg)
    uw_g = bilinear_up_matrix(Wg, W2)      # (W2, Wg)
    uh_p = bilinear_up_matrix(H2, H)       # (H, H2)
    uw_p = bilinear_up_matrix(W2, W)       # (W, W2)
    kg = jnp.asarray(np.kron(uh_g, uw_g).T)    # (HgWg, H2W2)
    kp = jnp.asarray(np.kron(uh_p, uw_p).T)    # (H2W2, HW)

    w_phi2d = w_phi.reshape(Ci, Cg)

    # Packed tiny per-channel operands: one block, one DMA.
    scal = jnp.stack([b_theta + b_phi,
                      w_psi.reshape(Ci),
                      jnp.full((Ci,), b_psi[0], f32)], axis=1)  # (Ci, 3)

    b_blk = _pick_batch_block(N)
    grid = (N // b_blk,)

    out_flat = pl.pallas_call(
        attention_block_kernel,
        out_shape=jax.ShapeDtypeStruct((N, Cin, HW), f32),
        grid_spec=pltpu.PrefetchScalarGridSpec(
            num_scalar_prefetch=0,
            grid=grid,
            in_specs=[
                pl.BlockSpec((b_blk, Cin, HW), lambda n: (n, 0, 0)),
                pl.BlockSpec((b_blk, Cg, HgWg), lambda n: (n, 0, 0)),
                pl.BlockSpec((4, Ci, Cin), lambda n: (0, 0, 0)),
                pl.BlockSpec((4, HW, H2W2), lambda n: (0, 0, 0)),
                pl.BlockSpec((Ci, Cg), lambda n: (0, 0)),
                pl.BlockSpec((HgWg, H2W2), lambda n: (0, 0)),
                pl.BlockSpec((H2W2, HW), lambda n: (0, 0)),
                pl.BlockSpec((Ci, 3), lambda n: (0, 0)),
            ],
            out_specs=pl.BlockSpec((b_blk, Cin, HW), lambda n: (n, 0, 0)),
        ),
        compiler_params=pltpu.CompilerParams(
            dimension_semantics=("parallel",),
            vmem_limit_bytes=32 * 1024 * 1024),
    )(x_flat, g_flat, w_taps, sel, w_phi2d, kg, kp, scal)

    # free reshape back to NCHW
    return out_flat.reshape(N, Cin, H, W)


# ----------------------------------------------------------------------------
# Pure-JAX reference (lax.conv + the same align_corners interpolation matrices)
# ----------------------------------------------------------------------------
def attention_block_reference(x, g, params):
    _, _, H, W = x.shape
    _, _, Hg, Wg = g.shape
    H2, W2 = H // 2, W // 2
    dn = ("NCHW", "OIHW", "NCHW")
    hi = jax.lax.Precision.HIGHEST

    theta = jax.lax.conv_general_dilated(
        x, params["w_theta"], (2, 2), "VALID", dimension_numbers=dn, precision=hi)
    theta = theta + params["b_theta"][None, :, None, None]

    phi = jax.lax.conv_general_dilated(
        g, params["w_phi"], (1, 1), "VALID", dimension_numbers=dn, precision=hi)
    phi = phi + params["b_phi"][None, :, None, None]

    uh_g = jnp.asarray(bilinear_up_matrix(Hg, H2))
    uw_g = jnp.asarray(bilinear_up_matrix(Wg, W2))
    phi_up = jnp.einsum("ia,jb,ncab->ncij", uh_g, uw_g, phi, precision=hi)

    act = jax.nn.relu(theta + phi_up)
    psi = jax.lax.conv_general_dilated(
        act, params["w_psi"], (1, 1), "VALID", dimension_numbers=dn, precision=hi)
    psi = jax.nn.sigmoid(psi + params["b_psi"][None, :, None, None])

    uh_p = jnp.asarray(bilinear_up_matrix(H2, H))
    uw_p = jnp.asarray(bilinear_up_matrix(W2, W))
    psi_up = jnp.einsum("ia,jb,ncab->ncij", uh_p, uw_p, psi, precision=hi)
    return psi_up * x   # expand_as(x) broadcast over the channel dim


# ----------------------------------------------------------------------------
if __name__ == "__main__":
    # shapes consistent with the module's forward-pass shape contract:
    # theta_x(x): H/2, up(phi_g(g)): 2*Hg  =>  Hg = H/4
    N, Cin, H, W = 2, 4, 16, 16
    Cg, Ci = 8, 8
    Hg, Wg = H // 4, W // 4

    key = jax.random.PRNGKey(0)
    kx, kgk, k1, k2, k3, k4, k5, k6 = jax.random.split(key, 8)

    x = jax.random.normal(kx, (N, Cin, H, W), jnp.float32)
    g = jax.random.normal(kgk, (N, Cg, Hg, Wg), jnp.float32)

    params = {
        "w_theta": 0.1 * jax.random.normal(k1, (Ci, Cin, 2, 2), jnp.float32),
        "b_theta": 0.1 * jax.random.normal(k2, (Ci,), jnp.float32),
        "w_phi":   0.1 * jax.random.normal(k3, (Ci, Cg, 1, 1), jnp.float32),
        "b_phi":   0.1 * jax.random.normal(k4, (Ci,), jnp.float32),
        "w_psi":   0.1 * jax.random.normal(k5, (1, Ci, 1, 1), jnp.float32),
        "b_psi":   0.1 * jax.random.normal(k6, (1,), jnp.float32),
    }

    out = jax.block_until_ready(attention_block_forward(x, g, params))
    ref = jax.block_until_ready(attention_block_reference(x, g, params))

    assert out.shape == (N, Cin, H, W)
    np.testing.assert_allclose(np.asarray(out), np.asarray(ref),
                               rtol=1e-4, atol=1e-5)
    print("KERNEL_OK")
</pallas_src>

<mosaic_0001>
module attributes {stable_mosaic.version = 11 : i64} {
  func.func @attention_block_kernel(%arg0: i32, %arg1: memref<1x4x256xf32, #tpu.memory_space<vmem>>, %arg2: memref<1x8x16xf32, #tpu.memory_space<vmem>>, %arg3: memref<4x8x4xf32, #tpu.memory_space<vmem>>, %arg4: memref<4x256x64xf32, #tpu.memory_space<vmem>>, %arg5: memref<8x8xf32, #tpu.memory_space<vmem>>, %arg6: memref<16x64xf32, #tpu.memory_space<vmem>>, %arg7: memref<64x256xf32, #tpu.memory_space<vmem>>, %arg8: memref<8x3xf32, #tpu.memory_space<vmem>>, %arg9: memref<1x4x256xf32, #tpu.memory_space<vmem>>) attributes {dimension_semantics = [#tpu.dimension_semantics<parallel>], iteration_bounds = array<i64: 2>, scalar_prefetch = 0 : i64, scratch_operands = 0 : i64, tpu.core_type = #tpu.core_type<tc>, window_params = [{transform_indices = @transform_0, window_bounds = array<i64: 1, 4, 256>}, {transform_indices = @transform_1, window_bounds = array<i64: 1, 8, 16>}, {pipeline_mode = #tpu.pipeline_mode<synchronous>, transform_indices = @transform_2, window_bounds = array<i64: 4, 8, 4>}, {pipeline_mode = #tpu.pipeline_mode<synchronous>, transform_indices = @transform_3, window_bounds = array<i64: 4, 256, 64>}, {pipeline_mode = #tpu.pipeline_mode<synchronous>, transform_indices = @transform_4, window_bounds = array<i64: 8, 8>}, {pipeline_mode = #tpu.pipeline_mode<synchronous>, transform_indices = @transform_5, window_bounds = array<i64: 16, 64>}, {pipeline_mode = #tpu.pipeline_mode<synchronous>, transform_indices = @transform_6, window_bounds = array<i64: 64, 256>}, {pipeline_mode = #tpu.pipeline_mode<synchronous>, transform_indices = @transform_7, window_bounds = array<i64: 8, 3>}, {transform_indices = @transform_8, window_bounds = array<i64: 1, 4, 256>}]} {
    %c0 = arith.constant 0 : index
    %c0_0 = arith.constant 0 : index
    %0 = vector.load %arg8[%c0, %c0_0] : memref<8x3xf32, #tpu.memory_space<vmem>>, vector<8x1xf32>
    %c0_1 = arith.constant 0 : index
    %c1 = arith.constant 1 : index
    %1 = vector.load %arg8[%c0_1, %c1] : memref<8x3xf32, #tpu.memory_space<vmem>>, vector<8x1xf32>
    %c0_2 = arith.constant 0 : index
    %c2 = arith.constant 2 : index
    %2 = vector.load %arg8[%c0_2, %c2] : memref<8x3xf32, #tpu.memory_space<vmem>>, vector<1x1xf32>
    %c0_3 = arith.constant 0 : index
    %c0_4 = arith.constant 0 : index
    %3 = vector.load %arg5[%c0_3, %c0_4] : memref<8x8xf32, #tpu.memory_space<vmem>>, vector<8x8xf32>
    %c0_5 = arith.constant 0 : index
    %c0_6 = arith.constant 0 : index
    %4 = vector.load %arg6[%c0_5, %c0_6] : memref<16x64xf32, #tpu.memory_space<vmem>>, vector<16x64xf32>
    %c0_7 = arith.constant 0 : index
    %c0_8 = arith.constant 0 : index
    %5 = vector.load %arg7[%c0_7, %c0_8] : memref<64x256xf32, #tpu.memory_space<vmem>>, vector<64x256xf32>
    %c0_9 = arith.constant 0 : index
    %c0_10 = arith.constant 0 : index
    %c0_11 = arith.constant 0 : index
    %6 = vector.load %arg4[%c0_9, %c0_10, %c0_11] : memref<4x256x64xf32, #tpu.memory_space<vmem>>, vector<1x256x64xf32>
    %7 = vector.shape_cast %6 : vector<1x256x64xf32> to vector<256x64xf32>
    %c1_12 = arith.constant 1 : index
    %c0_13 = arith.constant 0 : index
    %c0_14 = arith.constant 0 : index
    %8 = vector.load %arg4[%c1_12, %c0_13, %c0_14] : memref<4x256x64xf32, #tpu.memory_space<vmem>>, vector<1x256x64xf32>
    %9 = vector.shape_cast %8 : vector<1x256x64xf32> to vector<256x64xf32>
    %c2_15 = arith.constant 2 : index
    %c0_16 = arith.constant 0 : index
    %c0_17 = arith.constant 0 : index
    %10 = vector.load %arg4[%c2_15, %c0_16, %c0_17] : memref<4x256x64xf32, #tpu.memory_space<vmem>>, vector<1x256x64xf32>
    %11 = vector.shape_cast %10 : vector<1x256x64xf32> to vector<256x64xf32>
    %c3 = arith.constant 3 : index
    %c0_18 = arith.constant 0 : index
    %c0_19 = arith.constant 0 : index
    %12 = vector.load %arg4[%c3, %c0_18, %c0_19] : memref<4x256x64xf32, #tpu.memory_space<vmem>>, vector<1x256x64xf32>
    %13 = vector.shape_cast %12 : vector<1x256x64xf32> to vector<256x64xf32>
    %c0_20 = arith.constant 0 : index
    %c0_21 = arith.constant 0 : index
    %c0_22 = arith.constant 0 : index
    %14 = vector.load %arg3[%c0_20, %c0_21, %c0_22] : memref<4x8x4xf32, #tpu.memory_space<vmem>>, vector<1x8x4xf32>
    %15 = vector.shape_cast %14 : vector<1x8x4xf32> to vector<8x4xf32>
    %c1_23 = arith.constant 1 : index
    %c0_24 = arith.constant 0 : index
    %c0_25 = arith.constant 0 : index
    %16 = vector.load %arg3[%c1_23, %c0_24, %c0_25] : memref<4x8x4xf32, #tpu.memory_space<vmem>>, vector<1x8x4xf32>
    %17 = vector.shape_cast %16 : vector<1x8x4xf32> to vector<8x4xf32>
    %c2_26 = arith.constant 2 : index
    %c0_27 = arith.constant 0 : index
    %c0_28 = arith.constant 0 : index
    %18 = vector.load %arg3[%c2_26, %c0_27, %c0_28] : memref<4x8x4xf32, #tpu.memory_space<vmem>>, vector<1x8x4xf32>
    %19 = vector.shape_cast %18 : vector<1x8x4xf32> to vector<8x4xf32>
    %c3_29 = arith.constant 3 : index
    %c0_30 = arith.constant 0 : index
    %c0_31 = arith.constant 0 : index
    %20 = vector.load %arg3[%c3_29, %c0_30, %c0_31] : memref<4x8x4xf32, #tpu.memory_space<vmem>>, vector<1x8x4xf32>
    %21 = vector.shape_cast %20 : vector<1x8x4xf32> to vector<8x4xf32>
    %c0_32 = arith.constant 0 : index
    %c0_33 = arith.constant 0 : index
    %c0_34 = arith.constant 0 : index
    %22 = vector.load %arg1[%c0_32, %c0_33, %c0_34] : memref<1x4x256xf32, #tpu.memory_space<vmem>>, vector<1x4x256xf32>
    %23 = vector.shape_cast %22 : vector<1x4x256xf32> to vector<4x256xf32>
    %c0_35 = arith.constant 0 : index
    %c0_36 = arith.constant 0 : index
    %c0_37 = arith.constant 0 : index
    %24 = vector.load %arg2[%c0_35, %c0_36, %c0_37] : memref<1x8x16xf32, #tpu.memory_space<vmem>>, vector<1x8x16xf32>
    %25 = vector.shape_cast %24 : vector<1x8x16xf32> to vector<8x16xf32>
    %cst = arith.constant dense<0.000000e+00> : vector<4x64xf32>
    %26 = tpu.matmul %23, %7, %cst {dimension_numbers = #tpu.dot_dimension_numbers<[1], [0], [0], [1], [0, 0, 1, 1], [], []>} : vector<4x256xf32>, vector<256x64xf32>, vector<4x64xf32> -> vector<4x64xf32>
    %cst_38 = arith.constant dense<0.000000e+00> : vector<8x64xf32>
    %27 = tpu.matmul %15, %26, %cst_38 {dimension_numbers = #tpu.dot_dimension_numbers<[1], [0], [0], [1], [0, 0, 1, 1], [], []>} : vector<8x4xf32>, vector<4x64xf32>, vector<8x64xf32> -> vector<8x64xf32>
    %cst_39 = arith.constant dense<0.000000e+00> : vector<4x64xf32>
    %28 = tpu.matmul %23, %9, %cst_39 {dimension_numbers = #tpu.dot_dimension_numbers<[1], [0], [0], [1], [0, 0, 1, 1], [], []>} : vector<4x256xf32>, vector<256x64xf32>, vector<4x64xf32> -> vector<4x64xf32>
    %cst_40 = arith.constant dense<0.000000e+00> : vector<8x64xf32>
    %29 = tpu.matmul %17, %28, %cst_40 {dimension_numbers = #tpu.dot_dimension_numbers<[1], [0], [0], [1], [0, 0, 1, 1], [], []>} : vector<8x4xf32>, vector<4x64xf32>, vector<8x64xf32> -> vector<8x64xf32>
    %30 = arith.addf %27, %29 : vector<8x64xf32>
    %cst_41 = arith.constant dense<0.000000e+00> : vector<4x64xf32>
    %31 = tpu.matmul %23, %11, %cst_41 {dimension_numbers = #tpu.dot_dimension_numbers<[1], [0], [0], [1], [0, 0, 1, 1], [], []>} : vector<4x256xf32>, vector<256x64xf32>, vector<4x64xf32> -> vector<4x64xf32>
    %cst_42 = arith.constant dense<0.000000e+00> : vector<8x64xf32>
    %32 = tpu.matmul %19, %31, %cst_42 {dimension_numbers = #tpu.dot_dimension_numbers<[1], [0], [0], [1], [0, 0, 1, 1], [], []>} : vector<8x4xf32>, vector<4x64xf32>, vector<8x64xf32> -> vector<8x64xf32>
    %33 = arith.addf %30, %32 : vector<8x64xf32>
    %cst_43 = arith.constant dense<0.000000e+00> : vector<4x64xf32>
    %34 = tpu.matmul %23, %13, %cst_43 {dimension_numbers = #tpu.dot_dimension_numbers<[1], [0], [0], [1], [0, 0, 1, 1], [], []>} : vector<4x256xf32>, vector<256x64xf32>, vector<4x64xf32> -> vector<4x64xf32>
    %cst_44 = arith.constant dense<0.000000e+00> : vector<8x64xf32>
    %35 = tpu.matmul %21, %34, %cst_44 {dimension_numbers = #tpu.dot_dimension_numbers<[1], [0], [0], [1], [0, 0, 1, 1], [], []>} : vector<8x4xf32>, vector<4x64xf32>, vector<8x64xf32> -> vector<8x64xf32>
    %36 = arith.addf %33, %35 : vector<8x64xf32>
    %cst_45 = arith.constant dense<0.000000e+00> : vector<8x16xf32>
    %37 = tpu.matmul %3, %25, %cst_45 {dimension_numbers = #tpu.dot_dimension_numbers<[1], [0], [0], [1], [0, 0, 1, 1], [], []>} : vector<8x8xf32>, vector<8x16xf32>, vector<8x16xf32> -> vector<8x16xf32>
    %cst_46 = arith.constant dense<0.000000e+00> : vector<8x64xf32>
    %38 = tpu.matmul %37, %4, %cst_46 {dimension_numbers = #tpu.dot_dimension_numbers<[1], [0], [0], [1], [0, 0, 1, 1], [], []>} : vector<8x16xf32>, vector<16x64xf32>, vector<8x64xf32> -> vector<8x64xf32>
    %39 = arith.addf %36, %38 : vector<8x64xf32>
    %40 = vector.broadcast %0 : vector<8x1xf32> to vector<8x64xf32>
    %41 = arith.addf %39, %40 : vector<8x64xf32>
    %cst_47 = arith.constant 0.000000e+00 : f32
    %42 = vector.broadcast %cst_47 : f32 to vector<8x64xf32>
    %43 = arith.maximumf %41, %42 : vector<8x64xf32>
    %44 = vector.broadcast %1 : vector<8x1xf32> to vector<8x64xf32>
    %45 = arith.mulf %43, %44 : vector<8x64xf32>
    %cst_48 = arith.constant dense<0.000000e+00> : vector<64xf32>
    %46 = vector.multi_reduction <add>, %45, %cst_48 [0] : vector<8x64xf32> to vector<64xf32>
    %47 = vector.shape_cast %46 : vector<64xf32> to vector<1x64xf32>
    %48 = vector.broadcast %2 : vector<1x1xf32> to vector<1x64xf32>
    %49 = arith.addf %47, %48 : vector<1x64xf32>
    %50 = arith.negf %49 : vector<1x64xf32>
    %51 = math.exp %50 : vector<1x64xf32>
    %cst_49 = arith.constant 1.000000e+00 : f32
    %52 = vector.broadcast %cst_49 : f32 to vector<1x64xf32>
    %53 = arith.addf %52, %51 : vector<1x64xf32>
    %54 = arith.divf %52, %53 : vector<1x64xf32>
    %cst_50 = arith.constant dense<0.000000e+00> : vector<1x256xf32>
    %55 = tpu.matmul %54, %5, %cst_50 {dimension_numbers = #tpu.dot_dimension_numbers<[1], [0], [0], [1], [0, 0, 1, 1], [], []>} : vector<1x64xf32>, vector<64x256xf32>, vector<1x256xf32> -> vector<1x256xf32>
    %56 = vector.broadcast %55 : vector<1x256xf32> to vector<4x256xf32>
    %57 = arith.mulf %23, %56 : vector<4x256xf32>
    %c0_51 = arith.constant 0 : index
    %c0_52 = arith.constant 0 : index
    %c0_53 = arith.constant 0 : index
    %58 = vector.load %arg9[%c0_51, %c0_52, %c0_53] : memref<1x4x256xf32, #tpu.memory_space<vmem>>, vector<1x4x256xf32>
    %59 = vector.shape_cast %58 : vector<1x4x256xf32> to vector<4x256xf32>
    %60 = vector.shape_cast %57 : vector<4x256xf32> to vector<1x4x256xf32>
    tpu.vector_store %arg9[%c0_51, %c0_52, %c0_53], %60 {strides = array<i32>} : memref<1x4x256xf32, #tpu.memory_space<vmem>>, vector<1x4x256xf32>,
    return
  }
  func.func @transform_0(%arg0: i32) -> (i32, i32, i32) {
    %c0_i32 = arith.constant 0 : i32
    %c0_i32_0 = arith.constant 0 : i32
    %c0_i32_1 = arith.constant 0 : i32
    return %arg0, %c0_i32, %c0_i32_0 : i32, i32, i32
  }
  func.func @transform_1(%arg0: i32) -> (i32, i32, i32) {
    %c0_i32 = arith.constant 0 : i32
    %c0_i32_0 = arith.constant 0 : i32
    %c0_i32_1 = arith.constant 0 : i32
    return %arg0, %c0_i32, %c0_i32_0 : i32, i32, i32
  }
  func.func @transform_2(%arg0: i32) -> (i32, i32, i32) {
    %c0_i32 = arith.constant 0 : i32
    %c0_i32_0 = arith.constant 0 : i32
    %c0_i32_1 = arith.constant 0 : i32
    %c0_i32_2 = arith.constant 0 : i32
    return %c0_i32, %c0_i32_0, %c0_i32_1 : i32, i32, i32
  }
  func.func @transform_3(%arg0: i32) -> (i32, i32, i32) {
    %c0_i32 = arith.constant 0 : i32
    %c0_i32_0 = arith.constant 0 : i32
    %c0_i32_1 = arith.constant 0 : i32
    %c0_i32_2 = arith.constant 0 : i32
    return %c0_i32, %c0_i32_0, %c0_i32_1 : i32, i32, i32
  }
  func.func @transform_4(%arg0: i32) -> (i32, i32) {
    %c0_i32 = arith.constant 0 : i32
    %c0_i32_0 = arith.constant 0 : i32
    %c0_i32_1 = arith.constant 0 : i32
    return %c0_i32, %c0_i32_0 : i32, i32
  }
  func.func @transform_5(%arg0: i32) -> (i32, i32) {
    %c0_i32 = arith.constant 0 : i32
    %c0_i32_0 = arith.constant 0 : i32
    %c0_i32_1 = arith.constant 0 : i32
    return %c0_i32, %c0_i32_0 : i32, i32
  }
  func.func @transform_6(%arg0: i32) -> (i32, i32) {
    %c0_i32 = arith.constant 0 : i32
    %c0_i32_0 = arith.constant 0 : i32
    %c0_i32_1 = arith.constant 0 : i32
    return %c0_i32, %c0_i32_0 : i32, i32
  }
  func.func @transform_7(%arg0: i32) -> (i32, i32) {
    %c0_i32 = arith.constant 0 : i32
    %c0_i32_0 = arith.constant 0 : i32
    %c0_i32_1 = arith.constant 0 : i32
    return %c0_i32, %c0_i32_0 : i32, i32
  }
  func.func @transform_8(%arg0: i32) -> (i32, i32, i32) {
    %c0_i32 = arith.constant 0 : i32
    %c0_i32_0 = arith.constant 0 : i32
    %c0_i32_1 = arith.constant 0 : i32
    return %arg0, %c0_i32, %c0_i32_0 : i32, i32, i32
  }
}

</mosaic_0001>

<bundles_post_ra>
// kernel: tpu_custom_call.1
= control target key start
LH: loop header
LB: loop body
LE: loop exit
PB: predicated region body
PF: predicated region fallthrough
CT: control target
= control target key end

     0   :  { %13 = vsyncpa [#allocation3], 0  ;;  %s1875_s0 = inlined_call_operand.vmem [shape: f32[2,4,256], index: 0, kind: input, shape index: {}]   ;;  %s1876_s1 = inlined_call_operand.vmem [shape: f32[2,8,16], index: 1, kind: input, shape index: {}]   ;;  %s1877_s2 = inlined_call_operand.vmem [shape: f32[4,8,4], index: 2, kind: input, shape index: {}]   ;;  %s1878_s3 = inlined_call_operand.vmem [shape: f32[4,256,64], index: 3, kind: input, shape index: {}]   ;;  %s1879_s4 = inlined_call_operand.vmem [shape: f32[8,8], index: 4, kind: input, shape index: {}]   ;;  %s1880_s5 = inlined_call_operand.vmem [shape: f32[16,64], index: 5, kind: input, shape index: {}]   ;;  %s1881_s6 = inlined_call_operand.vmem [shape: f32[64,256], index: 6, kind: input, shape index: {}]   ;;  %s1882_s7 = inlined_call_operand.vmem [shape: f32[8,3], index: 7, kind: input, shape index: {}]   ;;  %s1883_s8 = inlined_call_operand.hbm [shape: f32[2,4,256], index: 8, kind: output, shape index: {}]  }
   0x1   :  { %15 = vsyncpa [#allocation3 + $0x1], 0  ;;  %s1294_s27 = smov 0   ;;  %s1296_s28 = smov 0  }
   0x2   :  { %s1298_s29 = smov 0   ;;  %s1300_s30 = smov 0  }
   0x3 LB: > { %s1315_s9 = sadd.s32 4294967295, %s1244_s30   ;;  %s1005_s10 = sadd.s32 4294967294, %s1244_s30   ;;  %s1244_s30 = sphi %s1300_s30, %s1889_s30   ;;  %s1240_s29 = sphi %s1298_s29, %s1888_s29   ;;  %s1236_s28 = sphi %s1296_s28, %s1887_s28   ;;  %s1232_s27 = sphi %s1294_s27, %s1886_s27  }
   0x4   : > { %s1319_s11 = sadd.s32 1, %s1244_s30   ;;  %s206_s12 = sadd.s32 1, %s1240_s29 }
   0x5   : > { %s203_s13 = ssub.s32 %s1244_s30, %s1319_s11  ;;  %p216_p0 = scmp.ne.s32.totalorder %s1240_s29, %s1236_s28 }
   0x6   : > { %p204_p1 = scmp.eq.s32.totalorder %s203_s13, 0  ;;  %p217_p2 = scmp.eq.s32.totalorder %s1315_s9, 1 }
   0x7   : > { %p222_p3 = scmp.ne.s32.totalorder %s1236_s28, %s1232_s27  ;;  %p223_p4 = scmp.eq.s32.totalorder %s1005_s10, 1 }
   0x8   : > { %s1330_s14 = scalar_select %p204_p1, %s1240_s29, %s206_s12  }
   0x9   : > { %p1332_p5 = por %p217_p2, %p216_p0  ;;  %p1336_p6 = por %p223_p4, %p222_p3 }
   0xa   : > { %p1008_p7 = scmp.ge.s32.totalorder %s1244_s30, 1  ;;  %p274_p8 = scmp.lt.s32.totalorder %s1244_s30, 3 }
   0xc   : > { %p275_p9 = pnand %p1008_p7, %p274_p8 }
   0xd   : > { %p312_p10 = scmp.lt.s32.totalorder (!%p275_p9), %s1315_s9, 1  ;;  %s309_s25 = sand.u32 (!%p275_p9), 1, %s1236_s28  }
   0xe   : > { %278 = sbr.rel (%p275_p9) target bundleno = 707 (0x2c3), region = 52  ;;  %s1009_s26 = sshll.u32 (!%p275_p9), %s309_s25, 3 }
  0x13   : > { %v1028_v0 = vld [vmem:[%s1878_s3 + $0x178] sm:$0xff]  ;;  %v1027_v2 = vld [vmem:[%s1878_s3 + $0x170] sm:$0xff]  ;;  %v1026_v4 = vld [vmem:[%s1878_s3 + $0x168] sm:$0xff]  ;;  %s1412_s22 = scalar_select %p312_p10, %s1315_s9, 1  ;;  %vm577_vm0 = vcmask 1043456   ;;  %vm573_vm1 = vcmask 31744  }
  0x14   : > { %v1044_v1 = vld [vmem:[%s1878_s3 + $0x1f8] sm:$0xff]  ;;  %533 = vmatpush.msra.mxu2 %v1028_v0  ;;  %v1043_v3 = vld [vmem:[%s1878_s3 + $0x1f0] sm:$0xff]  ;;  %v1042_v5 = vld [vmem:[%s1878_s3 + $0x1e8] sm:$0xff]  ;;  %vm771_vm2 = vcmask 64512   ;;  %vm795_vm3 = vcmask 130048   ;;  %vm832_vm4 = vcmask 523264  }
  0x15   : > { %553 = vmatpush.msra.mxu3 %v1044_v1  ;;  %v1025_v6 = vld [vmem:[%s1878_s3 + $0x160] sm:$0xff]  ;;  %v1024_v8 = vld [vmem:[%s1878_s3 + $0x158] sm:$0xff]  ;;  %v1023_v10 = vld [vmem:[%s1878_s3 + $0x150] sm:$0xff]  ;;  %s1130_s10 = sshll.u32 %s1412_s22, 3 }
  0x16   : > { %534 = vmatpush.msra.mxu2 %v1027_v2  ;;  %v1041_v7 = vld [vmem:[%s1878_s3 + $0x1e0] sm:$0xff]  ;;  %v1040_v9 = vld [vmem:[%s1878_s3 + $0x1d8] sm:$0xff]  ;;  %v1039_v11 = vld [vmem:[%s1878_s3 + $0x1d0] sm:$0xff]  ;;  %s316_s18 = scalar_lea.vmem %s1875_s0, %s1130_s10  ;;  %s320_s24 = scalar_lea.vmem %s1876_s1, %s1130_s10 }
  0x17   : > { %554 = vmatpush.msra.mxu3 %v1043_v3  ;;  %v1022_v12 = vld [vmem:[%s1878_s3 + $0x148] sm:$0xff]  ;;  %v1021_v14 = vld [vmem:[%s1878_s3 + $0x140] sm:$0xff]  ;;  %v357_v16 = vld [vmem:[%s1878_s3 + $0x78] sm:$0xff] }
  0x18   : > { %535 = vmatpush.msra.mxu2 %v1026_v4  ;;  %v1038_v13 = vld [vmem:[%s1878_s3 + $0x1c8] sm:$0xff]  ;;  %v1037_v15 = vld [vmem:[%s1878_s3 + $0x1c0] sm:$0xff]  ;;  %v1020_v17 = vld [vmem:[%s1878_s3 + $0x138] sm:$0xff]  ;;  %488 = vmatpush.msra.mxu0 %v357_v16 }
  0x19   : > { %555 = vmatpush.msra.mxu3 %v1042_v5  ;;  %v373_v18 = vld [vmem:[%s1878_s3 + $0xf8] sm:$0xff]  ;;  %v356_v20 = vld [vmem:[%s1878_s3 + $0x70] sm:$0xff]  ;;  %v355_v22 = vld [vmem:[%s1878_s3 + $0x68] sm:$0xff] }
  0x1a   : > { %536 = vmatpush.msra.mxu2 %v1025_v6  ;;  %v1036_v19 = vld [vmem:[%s1878_s3 + $0x1b8] sm:$0xff]  ;;  %508 = vmatpush.msra.mxu1 %v373_v18  ;;  %v372_v21 = vld [vmem:[%s1878_s3 + $0xf0] sm:$0xff]  ;;  %v371_v23 = vld [vmem:[%s1878_s3 + $0xe8] sm:$0xff] }
  0x1b   : > { %556 = vmatpush.msra.mxu3 %v1041_v7  ;;  %v1019_v24 = vld [vmem:[%s1878_s3 + $0x130] sm:$0xff]  ;;  %489 = vmatpush.msra.mxu0 %v356_v20  ;;  %v354_v26 = vld [vmem:[%s1878_s3 + $0x60] sm:$0xff]  ;;  %v1018_v28 = vld [vmem:[%s1878_s3 + $0x128] sm:$0xff] }
  0x1c   : > { %537 = vmatpush.msra.mxu2 %v1024_v8  ;;  %v1035_v25 = vld [vmem:[%s1878_s3 + $0x1b0] sm:$0xff]  ;;  %509 = vmatpush.msra.mxu1 %v372_v21  ;;  %v370_v27 = vld [vmem:[%s1878_s3 + $0xe0] sm:$0xff]  ;;  %v1034_v29 = vld [vmem:[%s1878_s3 + $0x1a8] sm:$0xff] }
  0x1d   : > { %557 = vmatpush.msra.mxu3 %v1040_v9  ;;  %490 = vmatpush.msra.mxu0 %v355_v22  ;;  %v353_v30 = vld [vmem:[%s1878_s3 + $0x58] sm:$0xff]  ;;  %v1017_v32 = vld [vmem:[%s1878_s3 + $0x120] sm:$0xff]  ;;  %v352_v34 = vld [vmem:[%s1878_s3 + $0x50] sm:$0xff] }
  0x1e   : > { %538 = vmatpush.msra.mxu2 %v1023_v10  ;;  %510 = vmatpush.msra.mxu1 %v371_v23  ;;  %v369_v31 = vld [vmem:[%s1878_s3 + $0xd8] sm:$0xff]  ;;  %v1033_v33 = vld [vmem:[%s1878_s3 + $0x1a0] sm:$0xff]  ;;  %v368_v35 = vld [vmem:[%s1878_s3 + $0xd0] sm:$0xff] }
  0x1f   : > { %558 = vmatpush.msra.mxu3 %v1039_v11  ;;  %491 = vmatpush.msra.mxu0 %v354_v26  ;;  %v1016_v36 = vld [vmem:[%s1878_s3 + $0x118] sm:$0xff]  ;;  %v351_v38 = vld [vmem:[%s1878_s3 + $0x48] sm:$0xff]  ;;  %v1015_v40 = vld [vmem:[%s1878_s3 + $0x110] sm:$0xff] }
  0x20   : > { %539 = vmatpush.msra.mxu2 %v1022_v12  ;;  %511 = vmatpush.msra.mxu1 %v370_v27  ;;  %v1032_v37 = vld [vmem:[%s1878_s3 + $0x198] sm:$0xff]  ;;  %v367_v39 = vld [vmem:[%s1878_s3 + $0xc8] sm:$0xff]  ;;  %v1031_v41 = vld [vmem:[%s1878_s3 + $0x190] sm:$0xff] }
  0x21   : > { %559 = vmatpush.msra.mxu3 %v1038_v13  ;;  %492 = vmatpush.msra.mxu0 %v353_v30  ;;  %v1480_v42 = vld [vmem:[%s316_s18] sm:$0xff]  ;;  %v1014_v45 = vld [vmem:[%s1878_s3 + $0x108] sm:$0xff]  ;;  %v349_v47 = vld [vmem:[%s1878_s3 + $0x38] sm:$0xff]  ;;  %s311_s18 = scalar_lea.vmem [#allocation2], %s1009_s26  ;;  %s1202_s26 = scalar_lea.hbm %s1883_s8, 16 }
  0x22   : > { %540 = vmatpush.msra.mxu2 %v1021_v14  ;;  %512 = vmatpush.msra.mxu1 %v369_v31  ;;  %v350_v43 = vld [vmem:[%s1878_s3 + $0x40] sm:$0xff]  ;;  %483 = vst [vmem:[#allocation1] ss:$2 sm:$0xff] %v1480_v42  ;;  %v1030_v46 = vld [vmem:[%s1878_s3 + $0x188] sm:$0xff]  ;;  %v365_v48 = vld [vmem:[%s1878_s3 + $0xb8] sm:$0xff]  ;;  %s931_s22 = sshll.u32 %s311_s18, 4  ;;  %s932_s22 = int_to_ptr.vmem [resolvable:$true] %s931_s22 }
  0x23   : > { %560 = vmatpush.msra.mxu3 %v1037_v15  ;;  %493 = vmatpush.msra.mxu0 %v352_v34  ;;  %v366_v44 = vld [vmem:[%s1878_s3 + $0xc0] sm:$0xff]  ;;  %v1060_v51 = vld [vmem:[%s1878_s3 + $0x278] sm:$0xff]  ;;  %v1059_v53 = vld [vmem:[%s1878_s3 + $0x270] sm:$0xff] }
  0x24   : > { %541 = vmatpush.msra.mxu2 %v1020_v17  ;;  %513 = vmatpush.msra.mxu1 %v368_v35  ;;  %v1013_v49 = vld [vmem:[%s1878_s3 + $0x100] sm:$0xff]  ;;  %v1076_v52 = vld [vmem:[%s1878_s3 + $0x2f8] sm:$0xff]  ;;  %v348_v54 = vld [vmem:[%s1878_s3 + $0x30] sm:$0xff] }
  0x25   : > { %561 = vmatpush.msra.mxu3 %v1036_v19  ;;  %494 = vmatpush.msra.mxu0 %v351_v38  ;;  %v1029_v50 = vld [vmem:[%s1878_s3 + $0x180] sm:$0xff]  ;;  %v364_v55 = vld [vmem:[%s1878_s3 + $0xb0] sm:$0xff]  ;;  %v347_v57 = vld [vmem:[%s1878_s3 + $0x28] sm:$0xff] }
  0x26   : > { %542 = vmatpush.msra.mxu2 %v1019_v24  ;;  %514 = vmatpush.msra.mxu1 %v367_v39  ;;  %v1075_v56 = vld [vmem:[%s1878_s3 + $0x2f0] sm:$0xff]  ;;  %v363_v58 = vld [vmem:[%s1878_s3 + $0xa8] sm:$0xff]  ;;  %v346_v63 = vld [vmem:[%s1878_s3 + $0x20] sm:$0xff] }
  0x27   : > { %562 = vmatpush.msra.mxu3 %v1035_v25  ;;  %495 = vmatpush.msra.mxu0 %v350_v43  ;;  %v1058_v61 = vld [vmem:[%s1878_s3 + $0x268] sm:$0xff]  ;;  %v362_v0 = vld [vmem:[%s1878_s3 + $0xa0] sm:$0xff]  ;;  %v345_v3 = vld [vmem:[%s1878_s3 + $0x18] sm:$0xff] }
  0x28   : > { %543 = vmatpush.msra.mxu2 %v1018_v28  ;;  %515 = vmatpush.msra.mxu1 %v366_v44  ;;  %v1074_v62 = vld [vmem:[%s1878_s3 + $0x2e8] sm:$0xff]  ;;  %v1057_v1 = vld [vmem:[%s1878_s3 + $0x260] sm:$0xff]  ;;  %v361_v4 = vld [vmem:[%s1878_s3 + $0x98] sm:$0xff] }
  0x29   : > { %563 = vmatpush.msra.mxu3 %v1034_v29  ;;  %496 = vmatpush.msra.mxu0 %v349_v47  ;;  %v1531_v59 = vld.sshfl [vmem:[#allocation1] sm:$0xff pattern:$0x75316420]  ;;  %v1533_v60 = vld.sshfl [vmem:[#allocation1 + $0x8] sm:$0xff pattern:$0x75316420] }
  0x2a   : > { %544 = vmatpush.msra.mxu2 %v1017_v32  ;;  %516 = vmatpush.msra.mxu1 %v365_v48  ;;  %528 = vst [vmem:[#allocation1] ss:$2 sm:$0xff] %v1480_v42  ;;  %v1073_v2 = vld [vmem:[%s1878_s3 + $0x2e0] sm:$0xff]  ;;  %v1056_v5 = vld [vmem:[%s1878_s3 + $0x258] sm:$0xff]  ;;  %v1055_v7 = vld [vmem:[%s1878_s3 + $0x250] sm:$0xff] }
  0x2b   : > { %564 = vmatpush.msra.mxu3 %v1033_v33  ;;  %497 = vmatpush.msra.mxu0 %v348_v54  ;;  %v1072_v6 = vld [vmem:[%s1878_s3 + $0x2d8] sm:$0xff]  ;;  %v1071_v8 = vld [vmem:[%s1878_s3 + $0x2d0] sm:$0xff]  ;;  %v1054_v13 = vld [vmem:[%s1878_s3 + $0x248] sm:$0xff] }
  0x2c   : > { %545 = vmatpush.msra.mxu2 %v1016_v36  ;;  %517 = vmatpush.msra.mxu1 %v364_v55  ;;  %v344_v9 = vld [vmem:[%s1878_s3 + $0x10] sm:$0xff]  ;;  %v1070_v14 = vld [vmem:[%s1878_s3 + $0x2c8] sm:$0xff]  ;;  %v1053_v17 = vld [vmem:[%s1878_s3 + $0x240] sm:$0xff] }
  0x2d   : > { %565 = vmatpush.msra.mxu3 %v1032_v37  ;;  %498 = vmatpush.msra.mxu0 %v347_v57  ;;  %v360_v10 = vld [vmem:[%s1878_s3 + $0x90] sm:$0xff]  ;;  %v343_v15 = vld [vmem:[%s1878_s3 + $0x8] sm:$0xff]  ;;  %v1069_v18 = vld [vmem:[%s1878_s3 + $0x2c0] sm:$0xff] }
  0x2e   : > { %546 = vmatpush.msra.mxu2 %v1015_v40  ;;  %518 = vmatpush.msra.mxu1 %v363_v58  ;;  %v359_v16 = vld [vmem:[%s1878_s3 + $0x88] sm:$0xff]  ;;  %v342_v19 = vld [vmem:[%s1878_s3] sm:$0xff]  ;;  %v1052_v21 = vld [vmem:[%s1878_s3 + $0x238] sm:$0xff] }
  0x2f   : > { %566 = vmatpush.msra.mxu3 %v1031_v41  ;;  %499 = vmatpush.msra.mxu0 %v346_v63  ;;  %v358_v20 = vld [vmem:[%s1878_s3 + $0x80] sm:$0xff]  ;;  %v1068_v22 = vld [vmem:[%s1878_s3 + $0x2b8] sm:$0xff]  ;;  %v1051_v23 = vld [vmem:[%s1878_s3 + $0x230] sm:$0xff] }
  0x30   : > { %547 = vmatpush.msra.mxu2 %v1014_v45  ;;  %519 = vmatpush.msra.mxu1 %v362_v0  ;;  %v1067_v24 = vld [vmem:[%s1878_s3 + $0x2b0] sm:$0xff]  ;;  %v1050_v27 = vld [vmem:[%s1878_s3 + $0x228] sm:$0xff]  ;;  %v1049_v29 = vld [vmem:[%s1878_s3 + $0x220] sm:$0xff] }
  0x31   : > { %567 = vmatpush.msra.mxu3 %v1030_v46  ;;  %500 = vmatpush.msra.mxu0 %v345_v3  ;;  %v529_v11 = vld.sshfl [vmem:[#allocation1] sm:$0xff pattern:$0x75316420]  ;;  %v530_v12 = vld.sshfl [vmem:[#allocation1 + $0x8] sm:$0xff pattern:$0x75316420] }
  0x32   : > { %548 = vmatpush.msra.mxu2 %v1013_v49  ;;  %520 = vmatpush.msra.mxu1 %v361_v4  ;;  %627 = vst [vmem:[#allocation1] ss:$2 sm:$0xff] %v1480_v42  ;;  %v1066_v28 = vld [vmem:[%s1878_s3 + $0x2a8] sm:$0xff]  ;;  %v1065_v30 = vld [vmem:[%s1878_s3 + $0x2a0] sm:$0xff]  ;;  %v1048_v31 = vld [vmem:[%s1878_s3 + $0x218] sm:$0xff] }
  0x33   : > { %568 = vmatpush.msra.mxu3 %v1029_v50  ;;  %549 = vmatmul.f32.vlgmr.msra.gmra.mxu2 %v529_v11  ;;  %v1064_v32 = vld [vmem:[%s1878_s3 + $0x298] sm:$0xff]  ;;  %v1047_v33 = vld [vmem:[%s1878_s3 + $0x210] sm:$0xff]  ;;  %v1046_v35 = vld [vmem:[%s1878_s3 + $0x208] sm:$0xff] }
  0x34   : > { %632 = vmatpush.msrb.mxu2 %v1060_v51  ;;  %569 = vmatmul.f32.vlgmr.msra.gmra.mxu3 %v530_v12  ;;  %v1063_v34 = vld [vmem:[%s1878_s3 + $0x290] sm:$0xff]  ;;  %v1062_v36 = vld [vmem:[%s1878_s3 + $0x288] sm:$0xff]  ;;  %v1045_v37 = vld [vmem:[%s1878_s3 + $0x200] sm:$0xff] }
  0x35   : > { %652 = vmatpush.msrb.mxu3 %v1076_v52  ;;  %501 = vmatpush.msra.mxu0 %v344_v9  ;;  %v1061_v38 = vld [vmem:[%s1878_s3 + $0x280] sm:$0xff]  ;;  %v1109_v43 = vld [vmem:[%s1877_s2 + $0x8] sm:$0xff]  ;;  %v1092_v48 = vld [vmem:[%s1878_s3 + $0x378] sm:$0xff] }
  0x36   : > { %633 = vmatpush.msrb.mxu2 %v1059_v53  ;;  %521 = vmatpush.msra.mxu1 %v360_v10  ;;  %v473_v47 = vld [vmem:[%s1877_s2] sm:$0xff]  ;;  %v1091_v49 = vld [vmem:[%s1878_s3 + $0x370] sm:$0xff]  ;;  %v1090_v50 = vld [vmem:[%s1878_s3 + $0x368] sm:$0xff] }
  0x37   : > { %653 = vmatpush.msrb.mxu3 %v1075_v56  ;;  %502 = vmatpush.msra.mxu0 %v343_v15  ;;  %v1089_v51 = vld [vmem:[%s1878_s3 + $0x360] sm:$0xff]  ;;  %v1088_v52 = vld [vmem:[%s1878_s3 + $0x358] sm:$0xff]  ;;  %v1087_v53 = vld [vmem:[%s1878_s3 + $0x350] sm:$0xff] }
  0x38   : > { %634 = vmatpush.msrb.mxu2 %v1058_v61  ;;  %522 = vmatpush.msra.mxu1 %v359_v16  ;;  %v1086_v54 = vld [vmem:[%s1878_s3 + $0x348] sm:$0xff]  ;;  %v1085_v55 = vld [vmem:[%s1878_s3 + $0x340] sm:$0xff]  ;;  %v1084_v56 = vld [vmem:[%s1878_s3 + $0x338] sm:$0xff] }
  0x39   : > { %654 = vmatpush.msrb.mxu3 %v1074_v62  ;;  %503 = vmatpush.msra.mxu0 %v342_v19  ;;  %v628_v25 = vld.sshfl [vmem:[#allocation1] sm:$0xff pattern:$0x75316420]  ;;  %v629_v26 = vld.sshfl [vmem:[#allocation1 + $0x8] sm:$0xff pattern:$0x75316420] }
  0x3a   : > { %635 = vmatpush.msrb.mxu2 %v1057_v1  ;;  %523 = vmatpush.msra.mxu1 %v358_v20  ;;  %699 = vst [vmem:[#allocation1] ss:$2 sm:$0xff] %v1480_v42  ;;  %v1108_v61 = vld [vmem:[%s1878_s3 + $0x3f8] sm:$0xff]  ;;  %v1110_v62 = vld [vmem:[%s1877_s2 + $0x10] sm:$0xff]  ;;  %v1082_v63 = vld [vmem:[%s1878_s3 + $0x328] sm:$0xff] }
  0x3b   : > { %655 = vmatpush.msrb.mxu3 %v1073_v2  ;;  %504 = vmatmul.f32.vlgmr.msra.gmra.mxu0 %v1531_v59  ;;  %v1083_v59 = vld [vmem:[%s1878_s3 + $0x330] sm:$0xff]  ;;  %v481_v1 = vld [vmem:[%s320_s24] sm:$0xff]  ;;  %v1106_v4 = vld [vmem:[%s1878_s3 + $0x3e8] sm:$0xff]  ;;  %s1131_s24 = sshll.u32 %s1315_s9, 3  ;;  %s918_s9 = scalar_lea.sflag [#allocation3], %s309_s25 }
  0x3c   : > { %636 = vmatpush.msrb.mxu2 %v1056_v5  ;;  %524 = vmatmul.f32.vlgmr.msra.gmra.mxu1 %v1533_v60  ;;  %v1107_v0 = vld [vmem:[%s1878_s3 + $0x3f0] sm:$0xff]  ;;  %v323_v2 = vld [vmem:[%s1879_s4] sm:$0xff]  ;;  %v1080_v5 = vld [vmem:[%s1878_s3 + $0x318] sm:$0xff]  ;;  %s929_s17 = scalar_lea.hbm %s1883_s8, %s1131_s24 }
  0x3d   : > { %656 = vmatpush.msrb.mxu3 %v1072_v6  ;;  %v1081_v3 = vld [vmem:[%s1878_s3 + $0x320] sm:$0xff]  ;;  %v1078_v9 = vld [vmem:[%s1878_s3 + $0x308] sm:$0xff]  ;;  %v1103_v10 = vld [vmem:[%s1878_s3 + $0x3d0] sm:$0xff]  ;;  %s933_s19 = sshll.u32 %s929_s17, 4  ;;  %s934_s19 = int_to_ptr.hbm [resolvable:$true] %s933_s19 }
  0x3e   : > { %637 = vmatpush.msrb.mxu2 %v1055_v7  ;;  %v1105_v6 = vld [vmem:[%s1878_s3 + $0x3e0] sm:$0xff]  ;;  %v1079_v7 = vld [vmem:[%s1878_s3 + $0x310] sm:$0xff]  ;;  %v1102_v12 = vld [vmem:[%s1878_s3 + $0x3c8] sm:$0xff]  ;;  %s1196_s10 = sshra.s32 %s934_s19, 4  ;;  %s1197_s10 = int_to_ptr.hbm [resolvable:$true] %s1196_s10 }
  0x3f   : > { %657 = vmatpush.msrb.mxu3 %v1071_v8  ;;  %v1104_v8 = vld [vmem:[%s1878_s3 + $0x3d8] sm:$0xff]  ;;  %v1077_v11 = vld [vmem:[%s1878_s3 + $0x300] sm:$0xff]  ;;  %v1099_v16 = vld [vmem:[%s1878_s3 + $0x3b0] sm:$0xff]  ;;  %s1198_s20 = scalar_lea.hbm %s1197_s10, 8  ;;  %p1203_p0 = scmp.lt.s32.totalorder %s1197_s10, %s1883_s8 }
  0x40   : > { %638 = vmatpush.msrb.mxu2 %v1054_v13  ;;  %v1100_v15 = vld [vmem:[%s1878_s3 + $0x3b8] sm:$0xff]  ;;  %v1095_v20 = vld [vmem:[%s1878_s3 + $0x390] sm:$0xff]  ;;  %p1199_p11 = scmp.ne.s32.totalorder %s1197_s10, %s1198_s20  ;;  %p1204_p1 = scmp.lt.s32.totalorder %s1202_s26, %s1198_s20 }
  0x41   : > { %658 = vmatpush.msrb.mxu3 %v1070_v14  ;;  %v700_v13 = vld.sshfl [vmem:[#allocation1] sm:$0xff pattern:$0x75316420]  ;;  %v1096_v19 = vld [vmem:[%s1878_s3 + $0x398] sm:$0xff] }
  0x42   : > { %639 = vmatpush.msrb.mxu2 %v1053_v17  ;;  %v1101_v14 = vld [vmem:[%s1878_s3 + $0x3c0] sm:$0xff]  ;;  %v1098_v17 = vld [vmem:[%s1878_s3 + $0x3a8] sm:$0xff]  ;;  %p1200_p12 = pnand %p1199_p11, %p1332_p5  ;;  %p1205_p2 = por %p1204_p1, %p1203_p0 }
  0x43   : > { %659 = vmatpush.msrb.mxu3 %v1069_v18  ;;  %v1097_v18 = vld [vmem:[%s1878_s3 + $0x3a0] sm:$0xff] }
  0x44   : > { %640 = vmatpush.msrb.mxu2 %v1052_v21  ;;  %v1094_v21 = vld [vmem:[%s1878_s3 + $0x388] sm:$0xff]  ;;  %p1201_p13 = pneg %p1200_p12 }
  0x45   : > { %660 = vmatpush.msrb.mxu3 %v1068_v22  ;;  %v1093_v22 = vld [vmem:[%s1878_s3 + $0x380] sm:$0xff] }
  0x46   : > { %641 = vmatpush.msrb.mxu2 %v1051_v23  ;;  %v701_v23 = vld.sshfl [vmem:[#allocation1 + $0x8] sm:$0xff pattern:$0x75316420]  ;;  %p1206_p3 = pnand %p1205_p2, %p1201_p13 }
  0x47   : > { %661 = vmatpush.msrb.mxu3 %v1067_v24 }
  0x48   : > { %642 = vmatpush.msrb.mxu2 %v1050_v27 }
  0x49   : > { %662 = vmatpush.msrb.mxu3 %v1066_v28 }
  0x4a   : > { %643 = vmatpush.msrb.mxu2 %v1049_v29  ;;  %v325_v29 = vld [vmem:[%s1880_s5 + $0x8] sm:$0xff] }
  0x4b   : > { %663 = vmatpush.msrb.mxu3 %v1065_v30  ;;  %v324_v30 = vld [vmem:[%s1880_s5] sm:$0xff] }
  0x4c   : > { %644 = vmatpush.msrb.mxu2 %v1048_v31  ;;  %v321_v31 = vld [vmem:[%s1882_s7] sm:$0xff] }
  0x4d   : > { %664 = vmatpush.msrb.mxu3 %v1064_v32  ;;  %v1246_v32 = vmov 0  }
  0x4e   : > { %645 = vmatpush.msrb.mxu2 %v1047_v33  ;;  %1174 = vset.pattern.permute.xlu0 %v1246_v32  ;;  %v322_v33 = vld [vmem:[%s1882_s7] sm:$0x1] }
  0x4f   : > { %665 = vmatpush.msrb.mxu3 %v1063_v34  ;;  %822 = vperm.xlu0 %1174, %v321_v31   ;;  %v1247_v34 = vmov 2  }
  0x50   : > { %646 = vmatpush.msrb.mxu2 %v1046_v35  ;;  %1176 = vset.pattern.permute.xlu1 %v1247_v34 }
  0x51   : > { %666 = vmatpush.msrb.mxu3 %v1062_v36  ;;  %842 = vperm.xlu1 %1176, %v322_v33   ;;  %v1248_v36 = vmov 1  }
  0x52   : > { %647 = vmatpush.msrb.mxu2 %v1045_v37 }
  0x53   : > { %667 = vmatpush.msrb.mxu3 %v1061_v38  ;;  %648 = vmatmul.f32.vlgmr.msrb.gmra.mxu2 %v628_v25 }
  0x54   : > { %668 = vmatmul.f32.vlgmr.msrb.gmra.mxu3 %v629_v26 }
  0x55   : > { %790 = vmatpush.msra.mxu3 %v481_v1  ;;  %v331_v1 = vld [vmem:[%s1881_s6 + $0x28] sm:$0xff] }
  0x57   : > { %1175 = vset.pattern.permute.xlu0 %v1248_v36 }
  0x58   : > { %828 = vperm.xlu0 %1175, %v321_v31  }
  0x5c   : > { %1120 = vmatmul.msk.f32.vlgmr.msra.gmra.mxu3 %vm771_vm2, %v323_v2 }
  0x60   : > { %1177 = vset.pattern.permute.xlu0 %v1247_v34 }
  0xb6   : > { %v550_v39 = vpop.f32.mrf.mxu2 }
  0xb7   : > { %v570_v40 = vpop.f32.mrf.mxu3 }
  0xb8   : > { %v571_v41 = vadd.f32 %v570_v40, %v550_v39  ;;  %v505_v44 = vpop.f32.mrf.mxu0  ;;  %v1111_v40 = vld [vmem:[%s1877_s2 + $0x18] sm:$0xff] }
  0xb9   : > { %v525_v45 = vpop.f32.mrf.mxu1 }
  0xba   : > { %1112 = vmatpush.msk.msrb.mxu0 %vm577_vm0, %v571_v41  ;;  %v526_v46 = vadd.f32 %v525_v45, %v505_v44 }
  0xbb   : > { %1113 = vmatmul.msk.f32.vlgmr.msrb.gmra.mxu0 %vm573_vm1, %v1109_v43 }
  0xbc   : > { %1114 = vmatpush.msk.msrb.mxu1 %vm577_vm0, %v526_v46 }
  0xbd   : > { %1115 = vmatmul.msk.f32.vlgmr.msrb.gmra.mxu1 %vm573_vm1, %v473_v47 }
  0xbe   : > { %704 = vmatpush.msra.mxu1 %v1092_v48 }
  0xc0   : > { %705 = vmatpush.msra.mxu1 %v1091_v49  ;;  %v340_v49 = vld [vmem:[%s1881_s6 + $0x70] sm:$0xff] }
  0xc1   : > { %v823_v41 = vpop.permute.xlu0 %822 }
  0xc2   : > { %706 = vmatpush.msra.mxu1 %v1090_v50  ;;  %v341_v50 = vld [vmem:[%s1881_s6 + $0x78] sm:$0xff] }
  0xc3   : > { %896 = vmatpush.msrb.mxu3 %v341_v50 }
  0xc4   : > { %707 = vmatpush.msra.mxu1 %v1089_v51 }
  0xc6   : > { %708 = vmatpush.msra.mxu1 %v1088_v52  ;;  %v338_v52 = vld [vmem:[%s1881_s6 + $0x60] sm:$0xff] }
  0xc8   : > { %709 = vmatpush.msra.mxu1 %v1087_v53  ;;  %v339_v53 = vld [vmem:[%s1881_s6 + $0x68] sm:$0xff] }
  0xc9   : > { %897 = vmatpush.msrb.mxu3 %v339_v53 }
  0xca   : > { %710 = vmatpush.msra.mxu1 %v1086_v54  ;;  %v829_v48 = vpop.permute.xlu0 %828 }
  0xcc   : > { %711 = vmatpush.msra.mxu1 %v1085_v55  ;;  %v336_v55 = vld [vmem:[%s1881_s6 + $0x50] sm:$0xff] }
  0xce   : > { %712 = vmatpush.msra.mxu1 %v1084_v56  ;;  %v337_v56 = vld [vmem:[%s1881_s6 + $0x58] sm:$0xff] }
  0xcf   : > { %898 = vmatpush.msrb.mxu3 %v337_v56 }
  0xd0   : > { %713 = vmatpush.msra.mxu1 %v1083_v59  ;;  %v334_v59 = vld [vmem:[%s1881_s6 + $0x40] sm:$0xff] }
  0xd2   : > { %714 = vmatpush.msra.mxu1 %v1082_v63  ;;  %v333_v63 = vld [vmem:[%s1881_s6 + $0x38] sm:$0xff] }
  0xd4   : > { %715 = vmatpush.msra.mxu1 %v1081_v3  ;;  %v328_v3 = vld [vmem:[%s1881_s6 + $0x10] sm:$0xff] }
  0xd6   : > { %v649_v57 = vpop.f32.mrf.mxu2  ;;  %716 = vmatpush.msra.mxu1 %v1080_v5 }
  0xd7   : > { %v669_v58 = vpop.f32.mrf.mxu3 }
  0xd8   : > { %v670_v60 = vadd.f32 %v669_v58, %v649_v57  ;;  %717 = vmatpush.msra.mxu1 %v1079_v7  ;;  %v327_v7 = vld [vmem:[%s1881_s6 + $0x8] sm:$0xff] }
  0xda   : > { %1116 = vmatpush.msk.msra.mxu0 %vm577_vm0, %v670_v60  ;;  %718 = vmatpush.msra.mxu1 %v1078_v9  ;;  %v335_v60 = vld [vmem:[%s1881_s6 + $0x48] sm:$0xff]  ;;  %v843_v9 = vpop.permute.xlu1 %842 }
  0xdb   : > { %1117 = vmatmul.msk.f32.vlgmr.msra.gmra.mxu0 %vm573_vm1, %v1110_v62  ;;  %899 = vmatpush.msrb.mxu3 %v335_v60  ;;  %v332_v62 = vld [vmem:[%s1881_s6 + $0x30] sm:$0xff] }
  0xdc   : > { %724 = vmatpush.msrb.mxu0 %v1108_v61  ;;  %719 = vmatpush.msra.mxu1 %v1077_v11 }
  0xdd   : > { %720 = vmatmul.f32.vlgmr.msra.gmra.mxu1 %v700_v13  ;;  %900 = vmatpush.msrb.mxu3 %v333_v63 }
  0xde   : > { %725 = vmatpush.msrb.mxu0 %v1107_v0  ;;  %813 = vmatpush.msrb.mxu1 %v325_v29  ;;  %v330_v0 = vld [vmem:[%s1881_s6 + $0x20] sm:$0xff] }
  0xdf   : > { %v792_v35 = vpop.f32.mrf.mxu3  ;;  %901 = vmatpush.msrb.mxu3 %v331_v1 }
  0xe0   : > { %726 = vmatpush.msrb.mxu0 %v1106_v4  ;;  %814 = vmatpush.msrb.mxu1 %v324_v30  ;;  %v329_v4 = vld [vmem:[%s1881_s6 + $0x18] sm:$0xff] }
  0xe1   : > { %902 = vmatpush.msrb.mxu3 %v329_v4 }
  0xe2   : > { %727 = vmatpush.msrb.mxu0 %v1105_v6  ;;  %v326_v6 = vld [vmem:[%s1881_s6] sm:$0xff] }
  0xe3   : > { %903 = vmatpush.msrb.mxu3 %v327_v7 }
  0xe4   : > { %728 = vmatpush.msrb.mxu0 %v1104_v8 }
  0xe5   : > { %1121 = vmatmul.msk.f32.vlgmr.msrb.gmra.mxu1 %vm795_vm3, %v792_v35 }
  0xe6   : > { %729 = vmatpush.msrb.mxu0 %v1103_v10 }
  0xe8   : > { %730 = vmatpush.msrb.mxu0 %v1102_v12 }
  0xea   : > { %731 = vmatpush.msrb.mxu0 %v1101_v14 }
  0xec   : > { %732 = vmatpush.msrb.mxu0 %v1100_v15 }
  0xee   : > { %733 = vmatpush.msrb.mxu0 %v1099_v16 }
  0xf0   : > { %734 = vmatpush.msrb.mxu0 %v1098_v17 }
  0xf2   : > { %735 = vmatpush.msrb.mxu0 %v1097_v18 }
  0xf4   : > { %736 = vmatpush.msrb.mxu0 %v1096_v19 }
  0xf6   : > { %737 = vmatpush.msrb.mxu0 %v1095_v20 }
  0xf8   : > { %738 = vmatpush.msrb.mxu0 %v1094_v21 }
  0xfa   : > { %739 = vmatpush.msrb.mxu0 %v1093_v22 }
  0xfb   : > { %740 = vmatmul.f32.vlgmr.msrb.gmra.mxu0 %v701_v23 }
 0x138   : > { %v598_v24 = vpop.f32.mrf.mxu0 }
 0x13a   : > { %v624_v25 = vpop.f32.mrf.mxu1 }
 0x13b   : > { %v625_v26 = vadd.f32 %v624_v25, %v598_v24 }
 0x158   : > { %v695_v27 = vpop.f32.mrf.mxu0 }
 0x159   : > { %v698_v28 = vadd.f32 %v695_v27, %v625_v26 }
 0x15a   : > { %v721_v37 = vpop.f32.mrf.mxu1 }
 0x162   : > { %v816_v44 = vpop.f32.mrf.mxu1 }
 0x178   : > { %v741_v38 = vpop.f32.mrf.mxu0 }
 0x179   : > { %v742_v39 = vadd.f32 %v741_v38, %v721_v37 }
 0x17b   : > { %1118 = vmatpush.msk.msra.mxu2 %vm577_vm0, %v742_v39 }
 0x17c   : > { %1119 = vmatmul.msk.f32.vlgmr.msra.gmra.mxu2 %vm573_vm1, %v1111_v40 }
 0x17d   : > { %876 = vmatpush.msrb.mxu2 %v340_v49 }
 0x17f   : > { %877 = vmatpush.msrb.mxu2 %v338_v52 }
 0x181   : > { %878 = vmatpush.msrb.mxu2 %v336_v55 }
 0x183   : > { %879 = vmatpush.msrb.mxu2 %v334_v59 }
 0x185   : > { %880 = vmatpush.msrb.mxu2 %v332_v62 }
 0x187   : > { %881 = vmatpush.msrb.mxu2 %v330_v0 }
 0x189   : > { %882 = vmatpush.msrb.mxu2 %v328_v3 }
 0x18b   : > { %883 = vmatpush.msrb.mxu2 %v326_v6 }
 0x1ff   : > { %v767_v43 = vpop.f32.mrf.mxu2 }
 0x200   : > { %v770_v45 = vadd.f32 %v767_v43, %v698_v28 }
 0x202   : > { %v819_v46 = vadd.f32 %v816_v44, %v770_v45 }
 0x204   : > { %v825_v47 = vadd.f32 %v823_v41, %v819_v46 }
 0x206   : > { %v826_v51 = vmax.f32 %v825_v47, 0.0 }
 0x208   : > { %v831_v54 = vmul.f32 %v829_v48, %v826_v51 }
 0x20a   : > { %v833_v57 = vsel %vm832_vm4, %v831_v54, 0.0 }
 0x20b   : > { %v834_v58 = vrot.slane %v833_v57, 4 }
 0x20d   : > { %v835_v61 = vadd.f32 %v834_v58, %v833_v57 }
 0x20f   : > { %v836_v2 = vrot.slane %v835_v61, 2 }
 0x211   : > { %v837_v5 = vadd.f32 %v836_v2, %v835_v61 }
 0x213   : > { %v838_v8 = vrot.slane %v837_v5, 1 }
 0x215   : > { %v839_v10 = vadd.f32 %v838_v8, %v837_v5 }
 0x217   : > { %v845_v11 = vadd.f32 %v843_v9, %v839_v10 }
 0x219   : > { %v1122_v12 = vmul.f32 -1.442695, %v845_v11 }
 0x21b   : > { %1178 = vpow2.f32 %v1122_v12 }
 0x221   : > { %v1179_v13 = vpop.eup %1178 }
 0x222   : > { %v849_v14 = vadd.f32 1.0, %v1179_v13 }
 0x224   : > { %1180 = vrcp.f32 %v849_v14  ;;  %v861_v18 = vand.u32 2147483648, %v849_v14  ;;  %v859_v20 = vand.u32 2147483647, %v849_v14  ;;  %vm855_vm6 = vweird.f32 %v849_v14 }
 0x226   : > { %v862_v22 = vor.u32 1.1754944e-38, %v861_v18  ;;  %vm860_vm8 = vcmp.eq.f32.partialorder %v859_v20, 8.507059e+37 }
 0x22a   : > { %v1181_v15 = vpop.eup %1180 }
 0x22b   : > { %v851_v16 = vmul.f32 %v1181_v15, %v849_v14  ;;  %vm856_vm5 = vweird.f32 %v1181_v15 }
 0x22c   : > { %vm857_vm7 = vmor %vm855_vm6, %vm856_vm5 }
 0x22d   : > { %v852_v17 = vsub.f32 1.0, %v851_v16 }
 0x22f   : > { %v853_v19 = vmul.f32 %v1181_v15, %v852_v17 }
 0x231   : > { %v854_v21 = vadd.f32 %v1181_v15, %v853_v19 }
 0x233   : > { %v858_v23 = vsel %vm857_vm7, %v1181_v15, %v854_v21 }
 0x234   : > { %v863_v24 = vsel %vm860_vm8, %v862_v22, %v858_v23 }
 0x235   : > { %1123 = vmatmul.msk.f32.vlgmr.msrb.gmra.mxu2 %vm832_vm4, %v863_v24  ;;  %1124 = vmatmul.msk.f32.vlgmr.msrb.gmra.mxu3 %vm832_vm4, %v863_v24 }
 0x2b8   : > { %v885_v25 = vpop.f32.mrf.mxu2  ;;  %v905_v26 = vpop.f32.mrf.mxu3 }
 0x2b9   : > { %v909_v27 = vperm.slane %v905_v26, 0  ;;  %v908_v28 = vperm.slane %v885_v25, 0 }
 0x2bb   : > { %v912_v29 = vrot.slane %v909_v27, 4 }
 0x2bd   : > { %v913_v30 = vsel %vm577_vm0, %v908_v28, %v912_v29 }
 0x2be   : > { %v915_v31 = vmul.f32 %v913_v30, %v1480_v42 }
 0x2c0   : > { %916 = vst [vmem:[%s311_s18] sm:$0xff] %v915_v31 }
 0x2c1   : > { %1209 = shalt.err (!%p1206_p3)
}
 0x2c2   : > { %1132 = dma.vmem_to_hbm [thread:$0]  (%p1332_p5), %s932_s22, 128, %s934_s19, %s918_s9  }
 0x2c3 PF: > { %p1138_p4 = scmp.ge.s32.totalorder %s1244_s30, 2  ;;  %s945_s25 = sand.u32 1, %s1232_s27  }
 0x2c4   : > { %s946_s13 = scalar_lea.sflag [#allocation3], %s945_s25 }
 0x2c5   : > { %p1135_p7 = pnand %p1138_p4, %p1336_p6 }
 0x2c7   : > { %p1136_p8 = pneg %p1135_p7 }
 0x2c9   : > { %1227 = dma.done.wait (%p1136_p8), %s946_s13, 128  }
 0x2ca   : > { %1229 = vsyncadd (%p1136_p8), %s946_s13, 4294967168  ;;  %p18_p9 = scmp.ge.s32.totalorder %s1319_s11, 4   ;;  %s1886_s27 = smov %s1236_s28 }
 0x2cb   : > { %s1887_s28 = smov %s1240_s29  ;;  %s1888_s29 = smov %s1330_s14 }
 0x2cc   : > { %s1889_s30 = smov %s1319_s11  ;;  %20 = sbr.rel (!%p18_p9) target bundleno = 3 (0x3), region = 96 }
 0x2d1   :  { %952 = vsyncpa [#allocation3], 1 }
 0x2d2   :  { %954 = vsyncpa [#allocation3 + $0x1], 1 }

</bundles_post_ra>
